<compile_context>
chip_gen: v5e
topology: v5e:2x2
jax: 0.10.0
libtpu: 0.0.40
codegen_flags: <defaults>
</compile_context>

<pallas_src>
import jax
import jax.numpy as jnp
from jax.experimental import pallas as pl
from jax.experimental.pallas import tpu as pltpu


def _clone_add_kernel(x_ref, o_ref):
    # ModuleWithNecessaryClone.forward:
    #   y = relu(x); y_cloned = y.clone(); y_modified = y_cloned.add_(3.0)
    #   z = y + y_modified
    # The clone means the in-place add does NOT alias y, so z == 2*relu(x) + 3.
    o_ref[...] = 2.0 * jnp.maximum(x_ref[...], 0.0) + 3.0


def module_with_necessary_clone(x):
    """Pallas implementation of ModuleWithNecessaryClone.forward (any float shape)."""
    orig_shape = x.shape
    orig_dtype = x.dtype
    total = x.size
    itemsize = jnp.dtype(orig_dtype).itemsize

    # ---- lane-dense 2D factorization, avoiding a pad/copy whenever possible ----
    LANE = None
    for cand in (1024, 512, 256, 128):
        if total % cand == 0:
            LANE = cand
            break

    if LANE is None:
        # TODO(synk): rare non-multiple-of-128 sizes; minimal pad to 128 lanes.
        LANE = 128
        pad = (-total) % LANE
        x_flat = jnp.concatenate(
            [jnp.reshape(x, (total,)), jnp.zeros((pad,), dtype=orig_dtype)]
        )
        padded_total = total + pad
    else:
        x_flat = jnp.reshape(x, (total,))
        padded_total = total

    rows = padded_total // LANE
    x2d = jnp.reshape(x_flat, (rows, LANE))

    # ---- block sizing: ~2 MiB tile; BlockSpec double-buffers in+out (4x tile live),
    # so 8 MiB fits the v5e 16 MiB scoped-VMEM default and v7x's 32 MiB. Rows are a
    # multiple of 8 (or the full row count for tiny inputs). Edge blocks may be
    # partial (grid uses cdiv); Pallas masks partial writes for this elementwise op.
    TARGET_TILE_BYTES = 2 * 1024 * 1024
    block_rows = max(8, TARGET_TILE_BYTES // (LANE * itemsize))
    block_rows = (block_rows // 8) * 8
    if block_rows >= rows:
        block_rows = rows  # single full block; row dim == full dim is allowed
    grid = (pl.cdiv(rows, block_rows),)

    out2d = pl.pallas_call(
        _clone_add_kernel,
        out_shape=jax.ShapeDtypeStruct((rows, LANE), orig_dtype),
        grid=grid,
        in_specs=[pl.BlockSpec((block_rows, LANE), lambda i: (i, 0))],
        out_specs=pl.BlockSpec((block_rows, LANE), lambda i: (i, 0)),
        compiler_params=pltpu.CompilerParams(
            # Single parallel axis: on v7x this shards the grid across both
            # TensorCores; on v5e/v6e it is harmless.
            dimension_semantics=("parallel",),
        ),
    )(x2d)

    if padded_total != total:
        out_flat = jnp.reshape(out2d, (padded_total,))[:total]
        return jnp.reshape(out_flat, orig_shape)
    return jnp.reshape(out2d, orig_shape)


if __name__ == "__main__":
    key = jax.random.PRNGKey(0)
    # Small NCHW-style input consistent with the elementwise module.
    x = jax.random.normal(key, (2, 4, 16, 16), dtype=jnp.float32)

    z = module_with_necessary_clone(x)
    jax.block_until_ready(z)

    # Reference: z = relu(x) + (relu(x) + 3)
    y_ref = jnp.maximum(x, 0.0)
    z_ref = y_ref + (y_ref + 3.0)
    assert z.shape == x.shape and z.dtype == x.dtype
    assert jnp.allclose(z, z_ref, atol=1e-6), "mismatch vs reference"

    print("KERNEL_OK")
</pallas_src>

<mosaic_0001>
module attributes {stable_mosaic.version = 11 : i64} {
  func.func @_clone_add_kernel(%arg0: i32, %arg1: memref<2x1024xf32, #tpu.memory_space<vmem>>, %arg2: memref<2x1024xf32, #tpu.memory_space<vmem>>) attributes {dimension_semantics = [#tpu.dimension_semantics<parallel>], iteration_bounds = array<i64: 1>, scalar_prefetch = 0 : i64, scratch_operands = 0 : i64, tpu.core_type = #tpu.core_type<tc>, window_params = [{transform_indices = @transform_0, window_bounds = array<i64: 2, 1024>}, {transform_indices = @transform_1, window_bounds = array<i64: 2, 1024>}]} {
    %c0 = arith.constant 0 : index
    %c0_0 = arith.constant 0 : index
    %0 = vector.load %arg1[%c0, %c0_0] : memref<2x1024xf32, #tpu.memory_space<vmem>>, vector<2x1024xf32>
    %cst = arith.constant 0.000000e+00 : f32
    %1 = vector.broadcast %cst : f32 to vector<2x1024xf32>
    %2 = arith.maximumf %0, %1 : vector<2x1024xf32>
    %cst_1 = arith.constant 2.000000e+00 : f32
    %3 = vector.broadcast %cst_1 : f32 to vector<2x1024xf32>
    %4 = arith.mulf %3, %2 : vector<2x1024xf32>
    %cst_2 = arith.constant 3.000000e+00 : f32
    %5 = vector.broadcast %cst_2 : f32 to vector<2x1024xf32>
    %6 = arith.addf %4, %5 : vector<2x1024xf32>
    %c0_3 = arith.constant 0 : index
    %c0_4 = arith.constant 0 : index
    %7 = vector.load %arg2[%c0_3, %c0_4] : memref<2x1024xf32, #tpu.memory_space<vmem>>, vector<2x1024xf32>
    tpu.vector_store %arg2[%c0_3, %c0_4], %6 {strides = array<i32>} : memref<2x1024xf32, #tpu.memory_space<vmem>>, vector<2x1024xf32>,
    return
  }
  func.func @transform_0(%arg0: i32) -> (i32, i32) {
    %c0_i32 = arith.constant 0 : i32
    %c0_i32_0 = arith.constant 0 : i32
    return %arg0, %c0_i32 : i32, i32
  }
  func.func @transform_1(%arg0: i32) -> (i32, i32) {
    %c0_i32 = arith.constant 0 : i32
    %c0_i32_0 = arith.constant 0 : i32
    return %arg0, %c0_i32 : i32, i32
  }
}

</mosaic_0001>

<bundles_post_ra>
// kernel: tpu_custom_call.1
= control target key start
LH: loop header
LB: loop body
LE: loop exit
PB: predicated region body
PF: predicated region fallthrough
CT: control target
= control target key end

     0   :  { %6 = vsyncpa [#allocation3], 0  ;;  %s122_s0 = inlined_call_operand.hbm [shape: f32[2,1024], index: 0, kind: input, shape index: {}]   ;;  %s123_s1 = inlined_call_operand.hbm [shape: f32[2,1024], index: 1, kind: output, shape index: {}]  }
   0x1   :  { %7 = vsyncpa [#allocation4], 0  ;;  %s13_s8 = sshll.u32 %s122_s0, 4  ;;  %s104_s9 = smov [#allocation2]   ;;  %s14_s8 = int_to_ptr.hbm [resolvable:$true] %s13_s8 }
   0x2   :  { %s15_s10 = sshll.u32 %s104_s9, 4  ;;  %s16_s10 = int_to_ptr.vmem [resolvable:$true] %s15_s10 }
   0x3   :  { %18 = dma.hbm_to_vmem [thread:$0]  %s14_s8, 256, %s16_s10, [#allocation3]  }
   0x4   :  { %100 = dma.done.wait [#allocation3], 256  }
   0x5   :  { %101 = vsyncadd [#allocation3], 4294967040  ;;  %v23_v0 = vld [vmem:[#allocation2] sm:$0xff]  ;;  %v24_v1 = vld [vmem:[#allocation2 + $0x8] sm:$0xff]  ;;  %s105_s11 = smov [#allocation5]   ;;  %s40_s15 = sshll.u32 %s123_s1, 4  ;;  %s41_s15 = int_to_ptr.hbm [resolvable:$true] %s40_s15 }
   0x6   :  { %v25_v2 = vmax.f32 %v23_v0, 0.0  ;;  %v26_v3 = vmax.f32 %v24_v1, 0.0  ;;  %s38_s12 = sshll.u32 %s105_s11, 4  ;;  %s39_s12 = int_to_ptr.vmem [resolvable:$true] %s38_s12 }
   0x8   :  { %v27_v4 = vmul.f32 2.0, %v25_v2  ;;  %v28_v5 = vmul.f32 2.0, %v26_v3 }
   0xa   :  { %v29_v6 = vadd.f32 3.0, %v27_v4  ;;  %v30_v7 = vadd.f32 3.0, %v28_v5 }
   0xc   :  { %31 = vst [vmem:[#allocation5] sm:$0xff] %v29_v6 }
   0xd   :  { %32 = vst [vmem:[#allocation5 + $0x8] sm:$0xff] %v30_v7 }
   0xe   :  { %43 = dma.vmem_to_hbm [thread:$0]  %s39_s12, 256, %s41_s15, [#allocation4]  }
   0xf   :  { %102 = dma.done.wait [#allocation4], 256  }
  0x10   :  { %103 = vsyncadd [#allocation4], 4294967040 }
  0x11   :  { %48 = vsyncpa [#allocation3], 1 }
  0x12   :  { %49 = vsyncpa [#allocation4], 1 }

</bundles_post_ra>
